<compile_context>
chip_gen: v5e
topology: v5e:2x2
jax: 0.10.0
libtpu: 0.0.40
codegen_flags: <defaults>
</compile_context>

<pallas_src>
import jax
import jax.numpy as jnp
from jax import lax
from jax.experimental import pallas as pl
from jax.experimental.pallas import tpu as pltpu


def _vector_output_kernel(v_ref, w1_ref, w2_ref, o_ref):
    # v_ref:  (tm, H)  row tile of flattened vector features (input dtype)
    # w1_ref: (H, H)   PyTorch Linear weight, (out_features, in_features)
    # w2_ref: (1, H)   PyTorch Linear weight
    # o_ref:  (1, tm)  lane-dense per-row scalars
    compute_dtype = w1_ref.dtype
    vb = v_ref[...].astype(compute_dtype)

    # h = v @ W1.T : contract the last dim of both operands (q @ k.T pattern);
    # bf16 operands, f32 accumulation on the MXU.  No wrapper-side transpose.
    h = lax.dot_general(
        vb, w1_ref[...],
        dimension_numbers=(((1,), (1,)), ((), ())),
        preferred_element_type=jnp.float32)            # (tm, H) f32

    h = h * jax.nn.sigmoid(h)                          # SiLU in f32 (v5e-safe)

    # Final H->1 projection, emitted lane-major: (1,H) . (tm,H)^T -> (1, tm)
    # so the tm per-row scalars land on lanes (unmasked, lane-dense store;
    # each output column depends only on its own row of h).
    row = lax.dot_general(
        w2_ref[...], h.astype(compute_dtype),
        dimension_numbers=(((1,), (1,)), ((), ())),
        preferred_element_type=jnp.float32)            # (1, tm) f32

    o_ref[...] = row.astype(o_ref.dtype)


def _round_down(x, m):
    return max(m, (x // m) * m)


def vector_output_forward(x, v, w1, w2, *, tm=None, compute_dtype=jnp.bfloat16):
    """Pallas implementation of VectorOutput.forward.

    x:  unused (kept for signature parity with the PyTorch module).
    v:  (..., H) array, e.g. (B, N, 3, H).
    w1: (H, H)  PyTorch Linear weight (out_features, in_features).
    w2: (1, H)  PyTorch Linear weight.
    Returns an array of shape v.shape[:-1].
    """
    del x
    H = v.shape[-1]
    lead_shape = v.shape[:-1]
    M = 1
    for d in lead_shape:
        M *= d
    v2d = v.reshape(M, H)                 # collapse leading dims (no copy)

    # Weights: keep the PyTorch (out, in) layout (no transpose pass over HBM);
    # cast once to the MXU-native dtype.  In a real model, do this cast once
    # at parameter-load time instead of per call.
    w_itemsize = jnp.dtype(compute_dtype).itemsize
    w1c = w1.astype(compute_dtype)
    w2c = w2.reshape(1, H).astype(compute_dtype)

    # Row-tile size: largest lane-dense tile whose working set (double-buffered
    # v tile + f32 intermediate h + double-buffered weights) stays under a
    # conservative ~20 MiB budget, so the pipeline keeps double-buffering on
    # v7x (64 MiB physical VMEM) as well as v5e/v6e.
    if tm is None:
        budget = 20 << 20
        w_bytes = 2 * (H * H + H) * w_itemsize          # weights must fit VMEM
        per_row = 2 * H * v.dtype.itemsize + 4 * H      # v dbl-buf + f32 h
        tm = (budget - w_bytes) // per_row if budget > w_bytes else 128
        tm = int(max(128, min(1024, _round_down(int(tm), 128))))
    if M <= tm:
        tm = M                       # single full-extent tile (always legal)
    else:
        tm = _round_down(int(tm), 128)   # lane-dense multiple of 128
    grid_m = pl.cdiv(M, tm)

    # Explicit scoped-VMEM limit with ~2x headroom, capped under v7x's 64 MiB.
    est = (2 * tm * H * v.dtype.itemsize              # v tile, double-buffered
           + 2 * (H * H + H) * w_itemsize             # weights, double-buffered
           + tm * H * 4                               # f32 intermediate h
           + 2 * tm * jnp.dtype(v.dtype).itemsize)    # output, double-buffered
    vmem_limit = int(min(max(2 * est, 32 << 20), 48 << 20))

    # TODO(synk): pipeline_mode=pl.Buffered(1) on the grid-invariant weight
    # specs would halve their VMEM footprint (useful on v7x for large H).

    out2d = pl.pallas_call(
        _vector_output_kernel,
        out_shape=jax.ShapeDtypeStruct((grid_m, tm), v.dtype),
        grid_spec=pltpu.PrefetchScalarGridSpec(
            num_scalar_prefetch=0,
            grid=(grid_m,),
            in_specs=[
                pl.BlockSpec((tm, H), lambda i: (i, 0)),   # row tile of v
                pl.BlockSpec((H, H), lambda i: (0, 0)),    # W1 (resident)
                pl.BlockSpec((1, H), lambda i: (0, 0)),    # W2 (resident)
            ],
            out_specs=pl.BlockSpec((1, tm), lambda i: (i, 0)),
        ),
        compiler_params=pltpu.CompilerParams(
            dimension_semantics=("parallel",),
            vmem_limit_bytes=vmem_limit),
    )(v2d, w1c, w2c)

    # (grid_m, tm) -> flat rows; drop the ragged tail computed on the partial
    # last input block; restore the original leading shape.
    return out2d.reshape(grid_m * tm)[:M].reshape(lead_shape)


def _reference_forward(v, w1, w2):
    h = v @ w1.T
    h = h * jax.nn.sigmoid(h)
    return (h @ w2.T)[..., 0]


if __name__ == "__main__":
    key = jax.random.PRNGKey(0)
    B, N, H = 2, 8, 32          # small hidden_channels for the synthetic test
    k_v, k_x, k_w1, k_w2 = jax.random.split(key, 4)

    # Deterministic parameter init (shapes match the nn.Linear weights).
    w1 = jax.random.normal(k_w1, (H, H), dtype=jnp.float32) * (1.0 / H ** 0.5)
    w2 = jax.random.normal(k_w2, (1, H), dtype=jnp.float32) * (1.0 / H ** 0.5)

    # Inputs: x is unused by forward; v carries the equivariant vector features.
    x = jax.random.normal(k_x, (B, N, H), dtype=jnp.float32)
    v = jax.random.normal(k_v, (B, N, 3, H), dtype=jnp.float32)

    out = vector_output_forward(x, v, w1, w2)
    out = jax.block_until_ready(out)

    ref = _reference_forward(v, w1, w2)
    assert out.shape == (B, N, 3), out.shape
    # bf16 MXU operands / f32 accumulation -> compare against the f32 reference
    # with a bf16-level tolerance.
    assert jnp.allclose(out, ref, atol=5e-2, rtol=5e-2), \
        float(jnp.max(jnp.abs(out - ref)))

    print("KERNEL_OK")
</pallas_src>

<mosaic_0001>
module attributes {stable_mosaic.version = 11 : i64} {
  func.func @_vector_output_kernel(%arg0: i32, %arg1: memref<48x32xf32, #tpu.memory_space<vmem>>, %arg2: memref<32x32xbf16, #tpu.memory_space<vmem>>, %arg3: memref<1x32xbf16, #tpu.memory_space<vmem>>, %arg4: memref<1x48xf32, #tpu.memory_space<vmem>>) attributes {dimension_semantics = [#tpu.dimension_semantics<parallel>], iteration_bounds = array<i64: 1>, scalar_prefetch = 0 : i64, scratch_operands = 0 : i64, tpu.core_type = #tpu.core_type<tc>, window_params = [{transform_indices = @transform_0, window_bounds = array<i64: 48, 32>}, {pipeline_mode = #tpu.pipeline_mode<synchronous>, transform_indices = @transform_1, window_bounds = array<i64: 32, 32>}, {pipeline_mode = #tpu.pipeline_mode<synchronous>, transform_indices = @transform_2, window_bounds = array<i64: 1, 32>}, {transform_indices = @transform_3, window_bounds = array<i64: 1, 48>}]} {
    %c0 = arith.constant 0 : index
    %c0_0 = arith.constant 0 : index
    %0 = vector.load %arg1[%c0, %c0_0] : memref<48x32xf32, #tpu.memory_space<vmem>>, vector<48x32xf32>
    %1 = arith.truncf %0 : vector<48x32xf32> to vector<48x32xbf16>
    %c0_1 = arith.constant 0 : index
    %c0_2 = arith.constant 0 : index
    %2 = vector.load %arg2[%c0_1, %c0_2] : memref<32x32xbf16, #tpu.memory_space<vmem>>, vector<32x32xbf16>
    %cst = arith.constant dense<0.000000e+00> : vector<48x32xf32>
    %3 = tpu.matmul %1, %2, %cst {dimension_numbers = #tpu.dot_dimension_numbers<[1], [1], [0], [0], [0, 0, 1, 0], [], []>} : vector<48x32xbf16>, vector<32x32xbf16>, vector<48x32xf32> -> vector<48x32xf32>
    %4 = arith.negf %3 : vector<48x32xf32>
    %5 = math.exp %4 : vector<48x32xf32>
    %cst_3 = arith.constant 1.000000e+00 : f32
    %6 = vector.broadcast %cst_3 : f32 to vector<48x32xf32>
    %7 = arith.addf %6, %5 : vector<48x32xf32>
    %8 = arith.divf %6, %7 : vector<48x32xf32>
    %9 = arith.mulf %3, %8 : vector<48x32xf32>
    %c0_4 = arith.constant 0 : index
    %c0_5 = arith.constant 0 : index
    %10 = vector.load %arg3[%c0_4, %c0_5] : memref<1x32xbf16, #tpu.memory_space<vmem>>, vector<1x32xbf16>
    %11 = arith.truncf %9 : vector<48x32xf32> to vector<48x32xbf16>
    %cst_6 = arith.constant dense<0.000000e+00> : vector<1x48xf32>
    %12 = tpu.matmul %10, %11, %cst_6 {dimension_numbers = #tpu.dot_dimension_numbers<[1], [1], [0], [0], [0, 0, 1, 0], [], []>} : vector<1x32xbf16>, vector<48x32xbf16>, vector<1x48xf32> -> vector<1x48xf32>
    %c0_7 = arith.constant 0 : index
    %c0_8 = arith.constant 0 : index
    %13 = vector.load %arg4[%c0_7, %c0_8] : memref<1x48xf32, #tpu.memory_space<vmem>>, vector<1x48xf32>
    tpu.vector_store %arg4[%c0_7, %c0_8], %12 {strides = array<i32>} : memref<1x48xf32, #tpu.memory_space<vmem>>, vector<1x48xf32>,
    return
  }
  func.func @transform_0(%arg0: i32) -> (i32, i32) {
    %c0_i32 = arith.constant 0 : i32
    %c0_i32_0 = arith.constant 0 : i32
    return %arg0, %c0_i32 : i32, i32
  }
  func.func @transform_1(%arg0: i32) -> (i32, i32) {
    %c0_i32 = arith.constant 0 : i32
    %c0_i32_0 = arith.constant 0 : i32
    %c0_i32_1 = arith.constant 0 : i32
    return %c0_i32, %c0_i32_0 : i32, i32
  }
  func.func @transform_2(%arg0: i32) -> (i32, i32) {
    %c0_i32 = arith.constant 0 : i32
    %c0_i32_0 = arith.constant 0 : i32
    %c0_i32_1 = arith.constant 0 : i32
    return %c0_i32, %c0_i32_0 : i32, i32
  }
  func.func @transform_3(%arg0: i32) -> (i32, i32) {
    %c0_i32 = arith.constant 0 : i32
    %c0_i32_0 = arith.constant 0 : i32
    return %arg0, %c0_i32 : i32, i32
  }
}

</mosaic_0001>

<bundles_post_ra>
// kernel: tpu_custom_call.1
= control target key start
LH: loop header
LB: loop body
LE: loop exit
PB: predicated region body
PF: predicated region fallthrough
CT: control target
= control target key end

     0   :  { %vm39_vm0 = vcmask 261120   ;;  %s499_s0 = inlined_call_operand.vmem [shape: f32[48,32], index: 0, kind: input, shape index: {}]   ;;  %s500_s1 = inlined_call_operand.vmem [shape: bf16[32,32], index: 1, kind: input, shape index: {}]   ;;  %s501_s2 = inlined_call_operand.vmem [shape: bf16[1,32], index: 2, kind: input, shape index: {}]   ;;  %s502_s3 = inlined_call_operand.hbm [shape: f32[1,48], index: 3, kind: output, shape index: {}]  }
   0x1   :  { %v265_v0 = vld [vmem:[%s500_s1 + $0x8] sm:$0xff] }
   0x2   :  { %v53_v1 = vsel %vm39_vm0, %v265_v0, 0 }
   0x3   :  { %8 = vsyncpa [#allocation3], 0  ;;  %61 = vmatpush.bf16.xpose.msra.mxu0 %v53_v1  ;;  %266 = vmatpush.bf16.xpose.msra.mxu2 %v53_v1  ;;  %v264_v2 = vld [vmem:[%s500_s1] sm:$0xff]  ;;  %v17_v5 = vld [vmem:[%s499_s0 + $0x8] sm:$0xff]  ;;  %s321_s28 = smov [#allocation2]   ;;  %s237_s5 = sshll.u32 %s502_s3, 4  ;;  %s238_s5 = int_to_ptr.hbm [resolvable:$true] %s237_s5 }
   0x4   :  { %267 = vmatpush.bf16.xpose.msra.mxu3 %v53_v1  ;;  %v50_v3 = vsel %vm39_vm0, %v264_v2, 0  ;;  %v16_v4 = vld [vmem:[%s499_s0] sm:$0xff]  ;;  %v18_v6 = vld [vmem:[%s499_s0 + $0x10] sm:$0xff]  ;;  %v19_v7 = vld [vmem:[%s499_s0 + $0x18] sm:$0xff]  ;;  %s235_s29 = sshll.u32 %s321_s28, 4  ;;  %s236_s29 = int_to_ptr.vmem [resolvable:$true] %s235_s29 }
   0x5   :  { %v20_v8 = vld [vmem:[%s499_s0 + $0x20] sm:$0xff]  ;;  %v21_v9 = vld [vmem:[%s499_s0 + $0x28] sm:$0xff]  ;;  %v22_v10 = vpack.c.bf16 %v17_v5, %v16_v4  ;;  %v23_v11 = vpack.c.bf16 %v19_v7, %v18_v6 }
   0x6   :  { %v24_v12 = vpack.c.bf16 %v21_v9, %v20_v8 }
   0xb   :  { %62 = vmatpush.bf16.xpose.msra.mxu0 %v50_v3  ;;  %268 = vmatpush.bf16.xpose.msra.mxu2 %v50_v3 }
   0xc   :  { %269 = vmatpush.bf16.xpose.msra.mxu3 %v50_v3 }
  0x12   :  { %254 = vmatmul.msk.bf16.vlgmr.msra.gmra.mxu0 %vm39_vm0, %v22_v10  ;;  %255 = vmatmul.msk.bf16.vlgmr.msra.gmra.mxu2 %vm39_vm0, %v23_v11 }
  0x13   :  { %256 = vmatmul.msk.bf16.vlgmr.msra.gmra.mxu3 %vm39_vm0, %v24_v12 }
  0x8f   :  { %v371_v13 = vpop.f32.mrf.mxu0 }
  0x90   :  { %v257_v19 = vmul.f32 -1.442695, %v371_v13 }
  0x95   :  { %v373_v14 = vpop.f32.mrf.mxu2 }
  0x96   :  { %v259_v15 = vmul.f32 -1.442695, %v373_v14  ;;  %v376_v16 = vpop.f32.mrf.mxu3 }
  0x97   :  { %v261_v17 = vmul.f32 -1.442695, %v376_v16  ;;  %v379_v18 = vpop.f32.mrf.mxu0 }
  0x98   :  { %271 = vpow2.f32 %v259_v15  ;;  %v258_v20 = vmul.f32 -1.442695, %v379_v18 }
  0x99   :  { %273 = vpow2.f32 %v261_v17 }
  0x9a   :  { %275 = vpow2.f32 %v257_v19 }
  0x9b   :  { %277 = vpow2.f32 %v258_v20 }
  0x9d   :  { %v383_v21 = vpop.f32.mrf.mxu2 }
  0x9e   :  { %v272_v22 = vpop.eup %271  ;;  %v260_v23 = vmul.f32 -1.442695, %v383_v21  ;;  %v386_v24 = vpop.f32.mrf.mxu3 }
  0x9f   :  { %v274_v25 = vpop.eup %273  ;;  %v262_v27 = vmul.f32 -1.442695, %v386_v24  ;;  %v389_v28 = vadd.f32 1.0, %v272_v22 }
  0xa0   :  { %v101_v26 = vadd.f32 1.0, %v274_v25  ;;  %279 = vpow2.f32 %v260_v23  ;;  %v276_v29 = vpop.eup %275 }
  0xa1   :  { %v278_v30 = vpop.eup %277  ;;  %v391_v32 = vadd.f32 1.0, %v276_v29  ;;  %vm138_vm2 = vweird.f32 %v389_v28  ;;  %v142_v56 = vand.u32 2147483647, %v389_v28  ;;  %v144_v12 = vand.u32 2147483648, %v389_v28 }
  0xa2   :  { %281 = vrcp.f32 %v101_v26  ;;  %v394_v33 = vadd.f32 1.0, %v278_v30  ;;  %v172_v50 = vand.u32 2147483647, %v101_v26  ;;  %vm168_vm3 = vweird.f32 %v101_v26 }
  0xa3   :  { %283 = vpow2.f32 %v262_v27  ;;  %v174_v57 = vand.u32 2147483648, %v101_v26  ;;  %vm108_vm7 = vweird.f32 %v391_v32 }
  0xa4   :  { %285 = vrcp.f32 %v389_v28  ;;  %vm421_vm4 = vcmp.eq.f32.partialorder %v172_v50, 8.507059e+37 }
  0xa5   :  { %v175_v5 = vor.u32 1.1754944e-38, %v174_v57 }
  0xa6   :  { %v280_v31 = vpop.eup %279 }
  0xa7   :  { %v396_v34 = vadd.f32 1.0, %v280_v31  ;;  %v129_v31 = vand.u32 2147483648, %v394_v33 }
  0xa8   :  { %v282_v35 = vpop.eup %281 }
  0xa9   :  { %v164_v36 = vmul.f32 %v282_v35, %v101_v26  ;;  %287 = vrcp.f32 %v396_v34  ;;  %v284_v37 = vpop.eup %283  ;;  %vm169_vm1 = vweird.f32 %v282_v35  ;;  %vm153_vm9 = vweird.f32 %v396_v34 }
  0xaa   :  { %289 = vrcp.f32 %v391_v32  ;;  %v102_v38 = vadd.f32 1.0, %v284_v37  ;;  %v401_v39 = vpop.eup %285  ;;  %vm425_vm5 = vmor %vm168_vm3, %vm169_vm1  ;;  %v157_v6 = vand.u32 2147483647, %v396_v34  ;;  %v159_v7 = vand.u32 2147483648, %v396_v34 }
  0xab   :  { %291 = vrcp.f32 %v394_v33  ;;  %v165_v40 = vsub.f32 1.0, %v164_v36  ;;  %v134_v42 = vmul.f32 %v401_v39, %v389_v28  ;;  %vm139_vm10 = vweird.f32 %v401_v39 }
  0xac   :  { %293 = vrcp.f32 %v102_v38  ;;  %v187_v0 = vand.u32 2147483647, %v102_v38  ;;  %v189_v1 = vand.u32 2147483648, %v102_v38  ;;  %vm183_vm12 = vweird.f32 %v102_v38  ;;  %vm453_vm15 = vmor %vm138_vm2, %vm139_vm10 }
  0xad   :  { %v166_v46 = vmul.f32 %v282_v35, %v165_v40  ;;  %v135_v49 = vsub.f32 1.0, %v134_v42  ;;  %vm123_vm1 = vweird.f32 %v394_v33  ;;  %vm158_vm3 = vcmp.eq.f32.partialorder %v157_v6, 8.507059e+37 }
  0xae   :  { %v190_v17 = vor.u32 1.1754944e-38, %v189_v1  ;;  %vm188_vm14 = vcmp.eq.f32.partialorder %v187_v0, 8.507059e+37  ;;  %v160_v25 = vor.u32 1.1754944e-38, %v159_v7  ;;  %v145_v28 = vor.u32 1.1754944e-38, %v144_v12 }
  0xaf   :  { %v403_v41 = vpop.eup %287  ;;  %v167_v53 = vadd.f32 %v282_v35, %v166_v46  ;;  %v136_v59 = vmul.f32 %v401_v39, %v135_v49  ;;  %v127_v36 = vand.u32 2147483647, %v394_v33  ;;  %v112_v40 = vand.u32 2147483647, %v391_v32 }
  0xb0   :  { %v407_v43 = vpop.eup %289  ;;  %v149_v44 = vmul.f32 %v403_v41, %v396_v34  ;;  %vm154_vm6 = vweird.f32 %v403_v41 }
  0xb1   :  { %v411_v45 = vpop.eup %291  ;;  %v104_v48 = vmul.f32 %v407_v43, %v391_v32  ;;  %v171_v2 = vsel %vm425_vm5, %v282_v35, %v167_v53  ;;  %v137_v8 = vadd.f32 %v401_v39, %v136_v59  ;;  %vm439_vm11 = vmor %vm153_vm9, %vm154_vm6  ;;  %vm109_vm2 = vweird.f32 %v407_v43 }
  0xb2   :  { %v150_v47 = vsub.f32 1.0, %v149_v44  ;;  %v294_v51 = vpop.eup %293  ;;  %v119_v52 = vmul.f32 %v411_v45, %v394_v33  ;;  %v176_v15 = vsel %vm421_vm4, %v175_v5, %v171_v2  ;;  %vm124_vm4 = vweird.f32 %v411_v45 }
  0xb3   :  { %v179_v55 = vmul.f32 %v294_v51, %v102_v38  ;;  %v105_v58 = vsub.f32 1.0, %v104_v48  ;;  %vm184_vm8 = vweird.f32 %v294_v51  ;;  %v141_v27 = vsel %vm453_vm15, %v401_v39, %v137_v8  ;;  %vm471_vm6 = vmor %vm123_vm1, %vm124_vm4 }
  0xb4   :  { %v151_v54 = vmul.f32 %v403_v41, %v150_v47  ;;  %v120_v63 = vsub.f32 1.0, %v119_v52  ;;  %vm185_vm13 = vmor %vm183_vm12, %vm184_vm8  ;;  %v197_v29 = vmul.f32 %v176_v15, %v376_v16  ;;  %vm143_vm5 = vcmp.eq.f32.partialorder %v142_v56, 8.507059e+37 }
  0xb5   :  { %v180_v61 = vsub.f32 1.0, %v179_v55  ;;  %v106_v11 = vmul.f32 %v407_v43, %v105_v58  ;;  %v114_v38 = vand.u32 2147483648, %v391_v32  ;;  %v146_v39 = vsel %vm143_vm5, %v145_v28, %v141_v27  ;;  %vm110_vm8 = vmor %vm108_vm7, %vm109_vm2 }
  0xb6   :  { %v152_v3 = vadd.f32 %v403_v41, %v151_v54  ;;  %v121_v19 = vmul.f32 %v411_v45, %v120_v63  ;;  %v130_v44 = vor.u32 1.1754944e-38, %v129_v31  ;;  %v195_v33 = vmul.f32 %v146_v39, %v373_v14 }
  0xb7   :  { %v181_v4 = vmul.f32 %v294_v51, %v180_v61  ;;  %vm128_vm9 = vcmp.eq.f32.partialorder %v127_v36, 8.507059e+37  ;;  %v115_v47 = vor.u32 1.1754944e-38, %v114_v38  ;;  %vm113_vm10 = vcmp.eq.f32.partialorder %v112_v40, 8.507059e+37 }
  0xb8   :  { %v156_v20 = vsel %vm439_vm11, %v403_v41, %v152_v3  ;;  %v122_v35 = vadd.f32 %v411_v45, %v121_v19  ;;  %vm228_vm7 = vcmask 385024  }
  0xb9   :  { %v182_v10 = vadd.f32 %v294_v51, %v181_v4  ;;  %v161_v34 = vsel %vm158_vm3, %v160_v25, %v156_v20 }
  0xba   :  { %v196_v41 = vmul.f32 %v161_v34, %v383_v21  ;;  %v126_v46 = vsel %vm471_vm6, %v411_v45, %v122_v35  ;;  %v199_v45 = vld [vmem:[%s501_s2] sm:$0x1] }
  0xbb   :  { %v186_v22 = vsel %vm185_vm13, %v294_v51, %v182_v10  ;;  %v131_v49 = vsel %vm128_vm9, %v130_v44, %v126_v46 }
  0xbc   :  { %v191_v26 = vsel %vm188_vm14, %v190_v17, %v186_v22  ;;  %v201_v21 = vpack.c.bf16 %v196_v41, %v195_v33  ;;  %v194_v51 = vmul.f32 %v131_v49, %v379_v18 }
  0xbd   :  { %v198_v30 = vmul.f32 %v191_v26, %v386_v24  ;;  %v107_v24 = vadd.f32 %v407_v43, %v106_v11 }
  0xbe   :  { %v210_v32 = vsel %vm39_vm0, %v201_v21, 0 }
  0xbf   :  { %v202_v37 = vpack.c.bf16 %v198_v30, %v197_v29  ;;  %v111_v48 = vsel %vm110_vm8, %v407_v43, %v107_v24 }
  0xc0   :  { %v116_v50 = vsel %vm113_vm10, %v115_v47, %v111_v48 }
  0xc1   :  { %v213_v42 = vsel %vm39_vm0, %v202_v37, 0  ;;  %v193_v52 = vmul.f32 %v116_v50, %v371_v13 }
  0xc2   :  { %220 = vmatpush.bf16.xpose.msra.mxu1 %v213_v42 }
  0xc3   :  { %v200_v14 = vpack.c.bf16 %v194_v51, %v193_v52 }
  0xc5   :  { %v207_v53 = vsel %vm39_vm0, %v200_v14, 0 }
  0xca   :  { %221 = vmatpush.bf16.xpose.msra.mxu1 %v210_v32 }
  0xd2   :  { %222 = vmatpush.bf16.xpose.msra.mxu1 %v207_v53 }
  0xd9   :  { %263 = vmatmul.msk.bf16.vlgmr.msra.gmra.mxu1 %vm39_vm0, %v199_v45 }
 0x156   :  { %v224_v13 = vpop.f32.mrf.mxu1 }
 0x157   :  { %229 = vst.msk [vmem:[#allocation2] sm:$0x1] %vm228_vm7, %v224_v13 }
 0x158   :  { %240 = dma.vmem_to_hbm [thread:$0]  %s236_s29, 16, %s238_s5, [#allocation3]  }
 0x15e   :  { %v226_v18 = vpop.f32.mrf.mxu1 }
 0x15f   :  { %319 = dma.done.wait [#allocation3], 16  }
 0x160   :  { %320 = vsyncadd [#allocation3], 4294967280 }
 0x161   :  { %245 = vsyncpa [#allocation3], 1 }

</bundles_post_ra>
